<compile_context>
chip_gen: v7x
topology: tpu7x:2x2x1
jax: 0.10.0
libtpu: 0.0.40
codegen_flags: <defaults>
</compile_context>

<pallas_src>
import functools

import jax
import jax.numpy as jnp
from jax import lax
from jax.experimental import pallas as pl
from jax.experimental.pallas import tpu as pltpu


def _pool_max_kernel(x_ref, o_ref, *, hw_total, hw_tile):
    """Running spatial max over the HW (last, "arbitrary") grid axis.

    x_ref block: (r_tile, hw_tile) with rows = flattened (batch*channel).
    o_ref block: (r_tile, 1), resident across the HW axis (accumulator).
    """
    ki = pl.program_id(1)

    @pl.when(ki == 0)
    def _():
        o_ref[...] = jnp.full(o_ref.shape, -jnp.inf, o_ref.dtype)

    x = x_ref[...]                                        # (r_tile, hw_tile)

    if hw_total % hw_tile == 0:
        # No padded tail anywhere: unmasked lane-reduce (XLU) on every tile.
        o_ref[...] = jnp.maximum(o_ref[...], jnp.max(x, axis=-1, keepdims=True))
    else:
        last = pl.num_programs(1) - 1

        @pl.when(ki != last)
        def _():
            o_ref[...] = jnp.maximum(
                o_ref[...], jnp.max(x, axis=-1, keepdims=True))

        @pl.when(ki == last)
        def _():
            # Only the final HW tile has padded (undefined) lanes: mask them to
            # -inf so they can never win the max (matters for all-negative x).
            lane = lax.broadcasted_iota(jnp.int32, x.shape, 1)
            valid = (ki * hw_tile + lane) < hw_total
            xm = jnp.where(valid, x, jnp.full_like(x, -jnp.inf))
            o_ref[...] = jnp.maximum(
                o_ref[...], jnp.max(xm, axis=-1, keepdims=True))


def _pick_tiles(R, HW, dtype):
    """Byte-budget-driven tiling of the flattened (R = N*C, HW) problem."""
    itemsize = jnp.dtype(dtype).itemsize
    budget = 4 * 1024 * 1024        # bytes per input block; double-buffered 8 MiB
                                    # fits v5e's 16 MiB scoped default and the
                                    # 32 MiB defaults on v6e/v7x (64 MiB physical).
    sub = max(8, 32 // itemsize)    # sublane granule: 8 f32 / 16 bf16 / 32 int8
    lane = 128
    row_cap = 1024                  # larger row tiles buy no extra bandwidth

    if R * HW * itemsize <= budget:
        r_tile, hw_tile = R, HW     # whole array in one block (full dims legal)
    elif sub * HW * itemsize <= budget:
        # Keep HW whole -> each block DMA is one fully contiguous HBM slab.
        hw_tile = HW
        r_tile = min(R, row_cap, budget // (HW * itemsize))
        r_tile = max(sub, (r_tile // sub) * sub)
        if r_tile >= R:
            r_tile = R
    else:
        # Rows are huge: minimal row granule, tile HW to fill the budget.
        r_tile = min(R, sub)
        hw_tile = max(lane, (budget // (r_tile * itemsize)) // lane * lane)
        if hw_tile >= HW:
            hw_tile = HW

    # v7x megacore: the row axis is the only "parallel" grid axis -- guarantee
    # >= 2 row blocks (one per TensorCore) whenever the rows can be split.
    n_row_blocks = -(-R // r_tile)
    if n_row_blocks < 2 and R >= 2 * sub:
        half = -(-R // 2)
        r_tile = min(r_tile, ((half + sub - 1) // sub) * sub)

    return r_tile, hw_tile


def pooling_f(x):
    """PoolingF forward: AdaptiveMaxPool2d(1) then L2 normalize over channels.

    x: (N, C, H, W) float array -> (N, C, 1, 1), same dtype as input.
    """
    if not jnp.issubdtype(x.dtype, jnp.floating):
        raise TypeError("pooling_f supports floating dtypes only "
                        "(running max uses a -inf identity).")

    N, C, H, W = x.shape
    HW = H * W
    R = N * C
    x_flat = x.reshape(R, HW)          # free reshape of contiguous NCHW

    r_tile, hw_tile = _pick_tiles(R, HW, x.dtype)
    grid = (pl.cdiv(R, r_tile), pl.cdiv(HW, hw_tile))

    kernel = functools.partial(_pool_max_kernel, hw_total=HW, hw_tile=hw_tile)

    pooled = pl.pallas_call(
        kernel,
        out_shape=jax.ShapeDtypeStruct((R, 1), x.dtype),
        grid_spec=pltpu.PrefetchScalarGridSpec(
            num_scalar_prefetch=0,
            grid=grid,
            in_specs=[
                pl.BlockSpec((r_tile, hw_tile), lambda ri, ki: (ri, ki)),
            ],
            out_specs=pl.BlockSpec((r_tile, 1), lambda ri, ki: (ri, 0)),
        ),
        compiler_params=pltpu.CompilerParams(
            dimension_semantics=("parallel", "arbitrary"),
        ),
    )(x_flat)

    # L2 normalize over channels on the tiny (N, C) pooled result (plain JAX).
    # TODO(synk): could be fused into the kernel finalize when all of C fits in
    # one row tile, but this N*C-element epilogue is negligible vs the HBM stream.
    pooled = pooled.reshape(N, C).astype(jnp.float32)
    norm = jnp.sqrt(jnp.sum(pooled * pooled, axis=1, keepdims=True))
    out = (pooled / (norm + 1e-7)).astype(x.dtype)
    return out.reshape(N, C, 1, 1)


def _reference(x):
    pooled = jnp.max(x, axis=(2, 3), keepdims=True)                  # (N, C, 1, 1)
    norm = jnp.sqrt(jnp.sum(pooled.astype(jnp.float32) ** 2, axis=1, keepdims=True))
    return (pooled / (norm + 1e-7)).astype(x.dtype)


if __name__ == "__main__":
    key = jax.random.PRNGKey(0)
    x = jax.random.normal(key, (2, 4, 16, 16), dtype=jnp.float32)

    out = pooling_f(x)
    out = jax.block_until_ready(out)

    ref = _reference(x)
    assert out.shape == (2, 4, 1, 1)
    assert jnp.allclose(out, ref, atol=1e-5, rtol=1e-5)

    print("KERNEL_OK")
</pallas_src>

<mosaic_0001>
module attributes {stable_mosaic.version = 11 : i64} {
  func.func @_pool_max_kernel(%arg0: i32, %arg1: i32, %arg2: memref<8x256xf32, #tpu.memory_space<vmem>>, %arg3: memref<8x1xf32, #tpu.memory_space<vmem>>) attributes {dimension_semantics = [#tpu.dimension_semantics<parallel>, #tpu.dimension_semantics<arbitrary>], iteration_bounds = array<i64: 1, 1>, scalar_prefetch = 0 : i64, scratch_operands = 0 : i64, tpu.core_type = #tpu.core_type<tc>, window_params = [{transform_indices = @transform_0, window_bounds = array<i64: 8, 256>}, {transform_indices = @transform_1, window_bounds = array<i64: 8, 1>}]} {
    %c0_i32 = arith.constant 0 : i32
    %0 = arith.cmpi eq, %arg1, %c0_i32 : i32
    %1 = arith.extui %0 : i1 to i32
    %c0_i32_0 = arith.constant 0 : i32
    %2 = arith.cmpi ne, %1, %c0_i32_0 : i32
    scf.if %2 {
      %cst_6 = arith.constant 0xFF800000 : f32
      %9 = vector.broadcast %cst_6 : f32 to vector<8x1xf32>
      %c0_7 = arith.constant 0 : index
      %c0_8 = arith.constant 0 : index
      %10 = vector.load %arg3[%c0_7, %c0_8] : memref<8x1xf32, #tpu.memory_space<vmem>>, vector<8x1xf32>
      tpu.vector_store %arg3[%c0_7, %c0_8], %9 {strides = array<i32>} : memref<8x1xf32, #tpu.memory_space<vmem>>, vector<8x1xf32>,
    } else {
    }
    %c0 = arith.constant 0 : index
    %c0_1 = arith.constant 0 : index
    %3 = vector.load %arg2[%c0, %c0_1] : memref<8x256xf32, #tpu.memory_space<vmem>>, vector<8x256xf32>
    %c0_2 = arith.constant 0 : index
    %c0_3 = arith.constant 0 : index
    %4 = vector.load %arg3[%c0_2, %c0_3] : memref<8x1xf32, #tpu.memory_space<vmem>>, vector<8x1xf32>
    %cst = arith.constant dense<0xFF800000> : vector<8xf32>
    %5 = vector.multi_reduction <maximumf>, %3, %cst [1] : vector<8x256xf32> to vector<8xf32>
    %6 = vector.shape_cast %5 : vector<8xf32> to vector<8x1xf32>
    %7 = arith.maximumf %4, %6 : vector<8x1xf32>
    %c0_4 = arith.constant 0 : index
    %c0_5 = arith.constant 0 : index
    %8 = vector.load %arg3[%c0_4, %c0_5] : memref<8x1xf32, #tpu.memory_space<vmem>>, vector<8x1xf32>
    tpu.vector_store %arg3[%c0_4, %c0_5], %7 {strides = array<i32>} : memref<8x1xf32, #tpu.memory_space<vmem>>, vector<8x1xf32>,
    return
  }
  func.func @transform_0(%arg0: i32, %arg1: i32) -> (i32, i32) {
    %c0_i32 = arith.constant 0 : i32
    return %arg0, %arg1 : i32, i32
  }
  func.func @transform_1(%arg0: i32, %arg1: i32) -> (i32, i32) {
    %c0_i32 = arith.constant 0 : i32
    %c0_i32_0 = arith.constant 0 : i32
    return %arg0, %c0_i32 : i32, i32
  }
}

</mosaic_0001>

<bundles_post_ra>
// kernel: tpu_custom_call.1
= control target key start
LH: loop header
LB: loop body
LE: loop exit
PB: predicated region body
PF: predicated region fallthrough
CT: control target
= control target key end

     0   :  { %6 = vsyncpa [#allocation3], 0  ;;  %s66_s6 = smov [#allocation2]   ;;  %s99_s0 = inlined_call_operand.hbm [shape: f32[8,256], index: 0, kind: input, shape index: {}]   ;;  %s100_s1 = inlined_call_operand.vmem [shape: f32[8,1], index: 1, kind: output, shape index: {}]  }
   0x1   :  { %s13_s7 = sshll.u32 %s66_s6, 4  ;;  %s42_s10 = scalar_lea.hbm %s99_s0, 256  ;;  %s14_s7 = int_to_ptr.vmem [resolvable:$true] %s13_s7 }
   0x2   :  { %p43_p0 = scmp.ne.s32.totalorder %s99_s0, %s42_s10  ;;  %p46_p1 = scmp.lt.u32.totalorder %s42_s10, %s99_s0 }
   0x4   :  { %p48_p2 = pnand %p46_p1, %p43_p0 }
   0x6   :  { %51 = shalt.err (!%p48_p2)
}
   0x7   :  { %s52_s15 = scalar_lea.vmem %s14_s7, 256  ;;  %p57_p4 = scmp.lt.s32.totalorder %s14_s7, %s14_s7 }
   0x8   :  { %p53_p3 = scmp.ne.s32.totalorder %s14_s7, %s52_s15  ;;  %p58_p5 = scmp.lt.s32.totalorder %s52_s15, %s52_s15 }
   0xa   :  { %p59_p6 = por %p58_p5, %p57_p4 }
   0xc   :  { %p60_p7 = pnand %p59_p6, %p53_p3 }
   0xe   :  { %63 = shalt.err (!%p60_p7)
}
   0xf   :  { %16 = dma.hbm_to_vmem [thread:$0]  %s99_s0, 256, %s14_s7, [#allocation3]  }
  0x10   :  { %64 = dma.done.wait [#allocation3], 256  }
  0x11   :  { %65 = vsyncadd [#allocation3], 4294967040  ;;  %vm24_vm0 = vcmask 7168   ;;  %v67_v0 = vmov -inf   ;;  %v26_v1 = vld [vmem:[#allocation2] sm:$0xff]  ;;  %v27_v2 = vld [vmem:[#allocation2 + $0x8] sm:$0xff] }
  0x12   :  { %25 = vst.msk [vmem:[%s100_s1] sm:$0xff] %vm24_vm0, %v67_v0  ;;  %v29_v3 = vmax.f32 %v26_v1, %v27_v2 }
  0x14   :  { %30 = vmax.xlane.f32.xlu0 %v29_v3 }
  0x19   :  { %v28_v4 = vld [vmem:[%s100_s1] sm:$0xff] }
  0xa1   :  { %v31_v5 = vpop.xlane.xlu0 %30 }
  0xa2   :  { %v32_v6 = vmax.f32 %v28_v4, %v31_v5 }
  0xa4   :  { %34 = vst.msk [vmem:[%s100_s1] sm:$0xff] %vm24_vm0, %v32_v6 }
  0xa5   :  { %39 = vsyncpa [#allocation3], 1 }

</bundles_post_ra>
